<compile_context>
chip_gen: v6e
topology: v6e:2x2x1
jax: 0.10.0
libtpu: 0.0.40
codegen_flags: <defaults>
</compile_context>

<pallas_src>
import jax
import jax.numpy as jnp
from jax.experimental import pallas as pl
from jax.experimental.pallas import tpu as pltpu


def _round_up(x, m):
    return ((x + m - 1) // m) * m


def ss_predictor_head_kernel(feats_ref, pw_ref, w1_ref, b1_ref, w2_ref, b2_ref,
                             out_ref, acc_ref):
    # feats_ref: (b_tile, s_tile, H) bf16/f32    pw_ref: (b_tile, 1, s_tile) same dtype
    # w1_ref:    (H, H)     f32 (pre-scaled by 1/S)
    # b1_ref:    (1, H)     f32
    # w2_ref:    (H, n_pad) f32
    # b2_ref:    (1, n_pad) f32
    # out_ref:   (b_tile, n_pad) f32             acc_ref: (b_tile, H) f32 scratch
    s_idx = pl.program_id(1)

    @pl.when(s_idx == 0)
    def _init():
        acc_ref[...] = jnp.zeros_like(acc_ref)

    # Partial pooled-sum for this sequence chunk on the MXU:
    # (b, 1, s) @ (b, s, H) -> (b, 1, H); bf16 operands, f32 accumulation.
    part = jnp.einsum("bqs,bsh->bqh", pw_ref[...], feats_ref[...],
                      preferred_element_type=jnp.float32)
    acc_ref[...] += part[:, 0, :]

    @pl.when(s_idx == pl.num_programs(1) - 1)
    def _finalize():
        pooled = acc_ref[...]                                   # 1/S folded into w1
        h = jnp.dot(pooled, w1_ref[...], preferred_element_type=jnp.float32)
        h = jnp.maximum(h + b1_ref[...], 0.0)
        out = jnp.dot(h, w2_ref[...], preferred_element_type=jnp.float32)
        out_ref[...] = (out + b2_ref[...]).astype(out_ref.dtype)


def _vmem_budgets():
    """Generation-aware (physical VMEM, feats streaming budget, scoped vmem limit)."""
    try:
        phys = int(pltpu.get_tpu_info().vmem_capacity_bytes)
    except Exception:                                  # conservative fallback
        phys = 64 * 1024 * 1024
    if phys > 96 * 1024 * 1024:                        # v5e / v6e: 128 MiB physical VMEM
        return phys, 32 * 1024 * 1024, 96 * 1024 * 1024
    return phys, 8 * 1024 * 1024, 48 * 1024 * 1024     # v7x: 64 MiB physical per TC


def _choose_tiles(B, S, H, itemsize, feats_budget):
    # --- batch tile: an exact divisor of B that is a multiple of 8 (or B itself) ---
    b_cands = [d for d in range(8, min(B, 128) + 1, 8) if B % d == 0]
    if not b_cands:
        b_cands = [B]                                  # full-dim block (e.g. B < 8)
    # megacore: prefer >= 2 tiles on the "parallel" batch axis (v7x has 2 TensorCores)
    split = [d for d in b_cands if B // d >= 2]
    b_tile = max(split) if split else max(b_cands)

    def feats_block_bytes(bt, st):
        return 2 * bt * st * H * itemsize              # double-buffered feats stream

    # jointly shrink b_tile if even a minimal 128-row S step busts the budget
    s_min = min(S, 128)
    while feats_block_bytes(b_tile, s_min) > feats_budget and b_tile > min(b_cands):
        b_tile = max(d for d in b_cands if d < b_tile)

    # --- sequence tile ---
    max_s = max(8, feats_budget // (2 * b_tile * H * itemsize))
    if S <= max_s:
        s_tile = S                                     # single step over the full sequence
    else:
        # largest multiple of 128 that divides S and fits the budget (no host pad needed)
        divs = [d for d in range(128, S + 1, 128) if S % d == 0 and d <= max_s]
        if divs:
            s_tile = max(divs)
        else:
            # ragged fallback: 128-aligned tile; S gets zero-padded (feats + pool weights)
            s_tile = max(128, (max_s // 128) * 128)
    return b_tile, s_tile


def ss_predictor_head(feats, w1, b1, w2, b2, *, b_tile=None, s_tile=None):
    """Fused seq-mean-pool + fc + relu + fc2 on a (B, S, H) feature tensor.

    Pooling is the plain mean over the sequence axis (== torch.mean(output[1], dim=1));
    there is no attention-mask re-weighting, matching the original module's forward.
    """
    B, S, H = feats.shape
    n_cls = w2.shape[1]
    n_pad = max(128, _round_up(n_cls, 128))            # lane-dense class dim
    itemsize = jnp.dtype(feats.dtype).itemsize

    vmem_phys, feats_budget, vmem_limit = _vmem_budgets()
    auto_b, auto_s = _choose_tiles(B, S, H, itemsize, feats_budget)
    if b_tile is None:
        b_tile = auto_b
    if s_tile is None:
        s_tile = auto_s

    # ---- host-side prep (tiny next to the (B, S, H) stream) ----
    w1_scaled = w1.astype(jnp.float32) / jnp.float32(S)            # fold the 1/S mean scale
    b1_2d = b1.reshape(1, H).astype(jnp.float32)
    w2_pad = jnp.zeros((H, n_pad), jnp.float32).at[:, :n_cls].set(w2.astype(jnp.float32))
    b2_pad = jnp.zeros((1, n_pad), jnp.float32).at[:, :n_cls].set(
        b2.reshape(1, n_cls).astype(jnp.float32))

    # Pooling weights: 1 over real positions, 0 over any padded tail -> exact plain mean.
    # Laid out (B, 1, S) so its contraction (s) axis matches the feats layout in the MXU op.
    S_pad = _round_up(S, s_tile)
    pool_w = jnp.ones((B, 1, S), feats.dtype)
    feats_in = feats
    if S_pad != S:
        # Rare ragged fallback only (s_tile normally divides S): this is the extra HBM
        # copy of the dominant tensor that the divisor-based tiling otherwise avoids.
        feats_in = jnp.pad(feats, ((0, 0), (0, S_pad - S), (0, 0)))
        pool_w = jnp.pad(pool_w, ((0, 0), (0, 0), (0, S_pad - S)))

    grid = (B // b_tile, S_pad // s_tile)

    # Up-front VMEM accounting: double-buffered streams + double-buffered resident
    # weights + accumulator scratch must fit under the scoped limit (and physical VMEM).
    est = (2 * b_tile * s_tile * H * itemsize            # feats blocks
           + 2 * b_tile * s_tile * itemsize              # pool-weight blocks
           + 2 * (H * H + H + H * n_pad + n_pad) * 4     # weights/biases (f32)
           + 2 * b_tile * n_pad * 4                      # output blocks
           + b_tile * H * 4)                             # accumulator scratch
    vmem_limit = min(vmem_phys, max(vmem_limit, int(est * 1.3) + (2 << 20)))

    out = pl.pallas_call(
        ss_predictor_head_kernel,
        out_shape=jax.ShapeDtypeStruct((B, n_pad), jnp.float32),
        grid_spec=pltpu.PrefetchScalarGridSpec(
            num_scalar_prefetch=0,
            grid=grid,
            in_specs=[
                # streamed over (batch, sequence)
                pl.BlockSpec((b_tile, s_tile, H), lambda b, s: (b, s, 0)),
                pl.BlockSpec((b_tile, 1, s_tile), lambda b, s: (b, 0, s)),
                # weights/biases: constant index maps -> fetched once, resident over S
                pl.BlockSpec((H, H), lambda b, s: (0, 0)),
                pl.BlockSpec((1, H), lambda b, s: (0, 0)),
                pl.BlockSpec((H, n_pad), lambda b, s: (0, 0)),
                pl.BlockSpec((1, n_pad), lambda b, s: (0, 0)),
            ],
            out_specs=pl.BlockSpec((b_tile, n_pad), lambda b, s: (b, 0)),
            scratch_shapes=[pltpu.VMEM((b_tile, H), jnp.float32)],
        ),
        compiler_params=pltpu.CompilerParams(
            dimension_semantics=("parallel", "arbitrary"),
            vmem_limit_bytes=int(vmem_limit),
        ),
    )(feats_in, pool_w, w1_scaled, b1_2d, w2_pad, b2_pad)

    return out[:, :n_cls]


def extractor_stub(input_ids, embed_table, attn_mask=None):
    """Deterministic stand-in for `self.extractor(input_ids, attn_mask=...)`.

    Returns a tuple whose element [1] is a (B, S, H) bf16 feature tensor, matching the
    usage `pool_feat = output[1]` in the PyTorch module.
    """
    # TODO(synk): the real extractor is an arbitrary external transformer backbone that
    #             consumes attn_mask internally; here it is a plain embedding lookup.
    del attn_mask
    feats = jnp.take(embed_table, input_ids, axis=0).astype(jnp.bfloat16)
    return (None, feats)


def ss_predictor_forward(data_dict, params):
    input_ids = data_dict["input_ids"]
    attention_mask = data_dict["attention_mask"]
    output = extractor_stub(input_ids, params["embed_table"], attn_mask=attention_mask)
    pool_feat = output[1]                                        # (B, S, H) bf16
    # dropout(eval) -> identity; mean-pool + fc + relu + fc2 fused in the Pallas kernel.
    return ss_predictor_head(pool_feat, params["w1"], params["b1"],
                             params["w2"], params["b2"])


if __name__ == "__main__":
    B, S, H = 2, 8, 32        # batch, seq, hidden (feat_num = hidden_size)
    VOCAB, N_CLS = 100, 3

    key = jax.random.PRNGKey(0)
    k_emb, k_ids, k_w1, k_b1, k_w2, k_b2 = jax.random.split(key, 6)

    params = {
        "embed_table": jax.random.normal(k_emb, (VOCAB, H), jnp.float32) * 0.1,
        # nn.Linear(feat_num, feat_num): weight stored here as (in, out)
        "w1": jax.random.normal(k_w1, (H, H), jnp.float32) * 0.1,
        "b1": jax.random.normal(k_b1, (H,), jnp.float32) * 0.1,
        # nn.Linear(feat_num, 3)
        "w2": jax.random.normal(k_w2, (H, N_CLS), jnp.float32) * 0.1,
        "b2": jax.random.normal(k_b2, (N_CLS,), jnp.float32) * 0.1,
    }

    data_dict = {
        "input_ids": jax.random.randint(k_ids, (B, S), 0, VOCAB, jnp.int32),
        "attention_mask": jnp.ones((B, S), jnp.int32),
    }

    logits = ss_predictor_forward(data_dict, params)
    jax.block_until_ready(logits)

    # Reference in plain JAX: plain mean over S (torch.mean semantics), f32 head.
    feats_ref = extractor_stub(data_dict["input_ids"], params["embed_table"])[1]
    pooled_ref = jnp.mean(feats_ref.astype(jnp.float32), axis=1)
    h_ref = jnp.maximum(pooled_ref @ params["w1"] + params["b1"], 0.0)
    logits_ref = h_ref @ params["w2"] + params["b2"]

    assert logits.shape == (B, N_CLS)
    assert jnp.allclose(logits, logits_ref, atol=1e-4, rtol=1e-4)

    print("KERNEL_OK")
</pallas_src>

<mosaic_0001>
module attributes {stable_mosaic.version = 11 : i64} {
  func.func @ss_predictor_head_kernel(%arg0: i32, %arg1: i32, %arg2: memref<2x8x32xbf16, #tpu.memory_space<vmem>>, %arg3: memref<2x1x8xbf16, #tpu.memory_space<vmem>>, %arg4: memref<32x32xf32, #tpu.memory_space<vmem>>, %arg5: memref<1x32xf32, #tpu.memory_space<vmem>>, %arg6: memref<32x128xf32, #tpu.memory_space<vmem>>, %arg7: memref<1x128xf32, #tpu.memory_space<vmem>>, %arg8: memref<2x128xf32, #tpu.memory_space<vmem>>, %arg9: memref<2x32xf32, #tpu.memory_space<vmem>>) attributes {dimension_semantics = [#tpu.dimension_semantics<parallel>, #tpu.dimension_semantics<arbitrary>], iteration_bounds = array<i64: 1, 1>, scalar_prefetch = 0 : i64, scratch_operands = 1 : i64, tpu.core_type = #tpu.core_type<tc>, window_params = [{transform_indices = @transform_0, window_bounds = array<i64: 2, 8, 32>}, {transform_indices = @transform_1, window_bounds = array<i64: 2, 1, 8>}, {pipeline_mode = #tpu.pipeline_mode<synchronous>, transform_indices = @transform_2, window_bounds = array<i64: 32, 32>}, {pipeline_mode = #tpu.pipeline_mode<synchronous>, transform_indices = @transform_3, window_bounds = array<i64: 1, 32>}, {pipeline_mode = #tpu.pipeline_mode<synchronous>, transform_indices = @transform_4, window_bounds = array<i64: 32, 128>}, {pipeline_mode = #tpu.pipeline_mode<synchronous>, transform_indices = @transform_5, window_bounds = array<i64: 1, 128>}, {transform_indices = @transform_6, window_bounds = array<i64: 2, 128>}]} {
    %c0_i32 = arith.constant 0 : i32
    %0 = arith.cmpi eq, %arg1, %c0_i32 : i32
    %1 = arith.extui %0 : i1 to i32
    %c0_i32_0 = arith.constant 0 : i32
    %2 = arith.cmpi ne, %1, %c0_i32_0 : i32
    scf.if %2 {
      %cst_12 = arith.constant 0.000000e+00 : f32
      %13 = vector.broadcast %cst_12 : f32 to vector<2x32xf32>
      %c0_13 = arith.constant 0 : index
      %c0_14 = arith.constant 0 : index
      %14 = vector.load %arg9[%c0_13, %c0_14] : memref<2x32xf32, #tpu.memory_space<vmem>>, vector<2x32xf32>
      tpu.vector_store %arg9[%c0_13, %c0_14], %13 {strides = array<i32>} : memref<2x32xf32, #tpu.memory_space<vmem>>, vector<2x32xf32>,
    } else {
    }
    %c0 = arith.constant 0 : index
    %c0_1 = arith.constant 0 : index
    %c0_2 = arith.constant 0 : index
    %3 = vector.load %arg3[%c0, %c0_1, %c0_2] : memref<2x1x8xbf16, #tpu.memory_space<vmem>>, vector<2x1x8xbf16>
    %c0_3 = arith.constant 0 : index
    %c0_4 = arith.constant 0 : index
    %c0_5 = arith.constant 0 : index
    %4 = vector.load %arg2[%c0_3, %c0_4, %c0_5] : memref<2x8x32xbf16, #tpu.memory_space<vmem>>, vector<2x8x32xbf16>
    "tpu.trace_start"() <{level = 10 : i32, message = "bqs,bsh->bqh"}> : () -> ()
    %cst = arith.constant dense<0.000000e+00> : vector<2x1x32xf32>
    %5 = tpu.matmul %3, %4, %cst {dimension_numbers = #tpu.dot_dimension_numbers<[2], [1], [1], [2], [0, 0, 0, 1, 1, 2], [0], [0]>} : vector<2x1x8xbf16>, vector<2x8x32xbf16>, vector<2x1x32xf32> -> vector<2x1x32xf32>
    "tpu.trace_stop"() : () -> ()
    %c0_6 = arith.constant 0 : index
    %c0_7 = arith.constant 0 : index
    %6 = vector.load %arg9[%c0_6, %c0_7] : memref<2x32xf32, #tpu.memory_space<vmem>>, vector<2x32xf32>
    %7 = vector.shape_cast %5 : vector<2x1x32xf32> to vector<2x32xf32>
    %8 = arith.addf %6, %7 : vector<2x32xf32>
    %c0_8 = arith.constant 0 : index
    %c0_9 = arith.constant 0 : index
    %9 = vector.load %arg9[%c0_8, %c0_9] : memref<2x32xf32, #tpu.memory_space<vmem>>, vector<2x32xf32>
    tpu.vector_store %arg9[%c0_8, %c0_9], %8 {strides = array<i32>} : memref<2x32xf32, #tpu.memory_space<vmem>>, vector<2x32xf32>,
    %c0_i32_10 = arith.constant 0 : i32
    %10 = arith.cmpi eq, %arg1, %c0_i32_10 : i32
    %11 = arith.extui %10 : i1 to i32
    %c0_i32_11 = arith.constant 0 : i32
    %12 = arith.cmpi ne, %11, %c0_i32_11 : i32
    scf.if %12 {
      %c0_12 = arith.constant 0 : index
      %c0_13 = arith.constant 0 : index
      %13 = vector.load %arg9[%c0_12, %c0_13] : memref<2x32xf32, #tpu.memory_space<vmem>>, vector<2x32xf32>
      %c0_14 = arith.constant 0 : index
      %c0_15 = arith.constant 0 : index
      %14 = vector.load %arg4[%c0_14, %c0_15] : memref<32x32xf32, #tpu.memory_space<vmem>>, vector<32x32xf32>
      %cst_16 = arith.constant dense<0.000000e+00> : vector<2x32xf32>
      %15 = tpu.matmul %13, %14, %cst_16 {dimension_numbers = #tpu.dot_dimension_numbers<[1], [0], [0], [1], [0, 0, 1, 1], [], []>} : vector<2x32xf32>, vector<32x32xf32>, vector<2x32xf32> -> vector<2x32xf32>
      %c0_17 = arith.constant 0 : index
      %c0_18 = arith.constant 0 : index
      %16 = vector.load %arg5[%c0_17, %c0_18] : memref<1x32xf32, #tpu.memory_space<vmem>>, vector<1x32xf32>
      %17 = vector.broadcast %16 : vector<1x32xf32> to vector<2x32xf32>
      %18 = arith.addf %15, %17 : vector<2x32xf32>
      %cst_19 = arith.constant 0.000000e+00 : f32
      %19 = vector.broadcast %cst_19 : f32 to vector<2x32xf32>
      %20 = arith.maximumf %18, %19 : vector<2x32xf32>
      %c0_20 = arith.constant 0 : index
      %c0_21 = arith.constant 0 : index
      %21 = vector.load %arg6[%c0_20, %c0_21] : memref<32x128xf32, #tpu.memory_space<vmem>>, vector<32x128xf32>
      %cst_22 = arith.constant dense<0.000000e+00> : vector<2x128xf32>
      %22 = tpu.matmul %20, %21, %cst_22 {dimension_numbers = #tpu.dot_dimension_numbers<[1], [0], [0], [1], [0, 0, 1, 1], [], []>} : vector<2x32xf32>, vector<32x128xf32>, vector<2x128xf32> -> vector<2x128xf32>
      %c0_23 = arith.constant 0 : index
      %c0_24 = arith.constant 0 : index
      %23 = vector.load %arg7[%c0_23, %c0_24] : memref<1x128xf32, #tpu.memory_space<vmem>>, vector<1x128xf32>
      %24 = vector.broadcast %23 : vector<1x128xf32> to vector<2x128xf32>
      %25 = arith.addf %22, %24 : vector<2x128xf32>
      %c0_25 = arith.constant 0 : index
      %c0_26 = arith.constant 0 : index
      %26 = vector.load %arg8[%c0_25, %c0_26] : memref<2x128xf32, #tpu.memory_space<vmem>>, vector<2x128xf32>
      tpu.vector_store %arg8[%c0_25, %c0_26], %25 {strides = array<i32>} : memref<2x128xf32, #tpu.memory_space<vmem>>, vector<2x128xf32>,
    } else {
    }
    return
  }
  func.func @transform_0(%arg0: i32, %arg1: i32) -> (i32, i32, i32) {
    %c0_i32 = arith.constant 0 : i32
    %c0_i32_0 = arith.constant 0 : i32
    return %arg0, %arg1, %c0_i32 : i32, i32, i32
  }
  func.func @transform_1(%arg0: i32, %arg1: i32) -> (i32, i32, i32) {
    %c0_i32 = arith.constant 0 : i32
    %c0_i32_0 = arith.constant 0 : i32
    return %arg0, %c0_i32, %arg1 : i32, i32, i32
  }
  func.func @transform_2(%arg0: i32, %arg1: i32) -> (i32, i32) {
    %c0_i32 = arith.constant 0 : i32
    %c0_i32_0 = arith.constant 0 : i32
    %c0_i32_1 = arith.constant 0 : i32
    return %c0_i32, %c0_i32_0 : i32, i32
  }
  func.func @transform_3(%arg0: i32, %arg1: i32) -> (i32, i32) {
    %c0_i32 = arith.constant 0 : i32
    %c0_i32_0 = arith.constant 0 : i32
    %c0_i32_1 = arith.constant 0 : i32
    return %c0_i32, %c0_i32_0 : i32, i32
  }
  func.func @transform_4(%arg0: i32, %arg1: i32) -> (i32, i32) {
    %c0_i32 = arith.constant 0 : i32
    %c0_i32_0 = arith.constant 0 : i32
    %c0_i32_1 = arith.constant 0 : i32
    return %c0_i32, %c0_i32_0 : i32, i32
  }
  func.func @transform_5(%arg0: i32, %arg1: i32) -> (i32, i32) {
    %c0_i32 = arith.constant 0 : i32
    %c0_i32_0 = arith.constant 0 : i32
    %c0_i32_1 = arith.constant 0 : i32
    return %c0_i32, %c0_i32_0 : i32, i32
  }
  func.func @transform_6(%arg0: i32, %arg1: i32) -> (i32, i32) {
    %c0_i32 = arith.constant 0 : i32
    %c0_i32_0 = arith.constant 0 : i32
    return %arg0, %c0_i32 : i32, i32
  }
}

</mosaic_0001>

<bundles_post_ra>
// kernel: tpu_custom_call.1
= control target key start
LH: loop header
LB: loop body
LE: loop exit
PB: predicated region body
PF: predicated region fallthrough
CT: control target
= control target key end

     0   :  { %11 = vsyncpa [#allocation4], 0  ;;  %s596_s0 = inlined_call_operand.hbm [shape: bf16[2,8,32], index: 0, kind: input, shape index: {}]   ;;  %s597_s1 = inlined_call_operand.vmem [shape: bf16[2,1,8], index: 1, kind: input, shape index: {}]   ;;  %s598_s2 = inlined_call_operand.hbm [shape: f32[32,32], index: 2, kind: input, shape index: {}]   ;;  %s599_s3 = inlined_call_operand.vmem [shape: f32[1,32], index: 3, kind: input, shape index: {}]   ;;  %s600_s4 = inlined_call_operand.hbm [shape: f32[32,128], index: 4, kind: input, shape index: {}]   ;;  %s601_s5 = inlined_call_operand.vmem [shape: f32[1,128], index: 5, kind: input, shape index: {}]   ;;  %s602_s6 = inlined_call_operand.hbm [shape: f32[2,128], index: 6, kind: output, shape index: {}]  }
   0x1   :  { %12 = vsyncpa [#allocation7], 0 }
   0x2   :  { %13 = vsyncpa [#allocation5], 0  ;;  %s521_s21 = smov [#allocation6]  }
   0x3   :  { %s33_s22 = sshll.u32 %s521_s21, 4  ;;  %s34_s22 = int_to_ptr.vmem [resolvable:$true] %s33_s22 }
   0x4   :  { %s443_s23 = scalar_lea.vmem %s34_s22, 512  ;;  %p448_p1 = scmp.lt.s32.totalorder %s34_s22, %s34_s22 }
   0x5   :  { %p444_p0 = scmp.ne.s32.totalorder %s34_s22, %s443_s23  ;;  %p449_p2 = scmp.lt.s32.totalorder %s443_s23, %s443_s23 }
   0x7   :  { %p450_p3 = por %p449_p2, %p448_p1 }
   0x9   :  { %p451_p4 = pnand %p450_p3, %p444_p0 }
   0xb   :  { %454 = shalt.err (!%p451_p4)
}
   0xc   :  { %s522_s24 = smov 128   ;;  %s523_s25 = smov 8  }
   0xd   :  { %39 = dma.hbm_to_vmem [thread:$0]  %s598_s2, 512, %s34_s22, [#allocation7], %s522_s24, %s522_s24, %s523_s25  }
   0xe   :  { %s524_s28 = smov [#allocation3]  }
   0xf   :  { %s19_s29 = sshll.u32 %s524_s28, 4  ;;  %s20_s29 = int_to_ptr.vmem [resolvable:$true] %s19_s29 }
  0x10   :  { %s463_s30 = scalar_lea.vmem %s20_s29, 128  ;;  %p468_p6 = scmp.lt.s32.totalorder %s20_s29, %s20_s29 }
  0x11   :  { %p464_p5 = scmp.ne.s32.totalorder %s20_s29, %s463_s30  ;;  %p469_p7 = scmp.lt.s32.totalorder %s463_s30, %s463_s30 }
  0x13   :  { %p470_p8 = por %p469_p7, %p468_p6 }
  0x15   :  { %p471_p9 = pnand %p470_p8, %p464_p5 }
  0x17   :  { %474 = shalt.err (!%p471_p9)
}
  0x18   :  { %s525_s7 = smov 64   ;;  %s526_s8 = smov 4  }
  0x19   :  { %25 = dma.hbm_to_vmem [thread:$0]  %s596_s0, 128, %s20_s29, [#allocation4], %s525_s7, %s525_s7, %s526_s8  }
  0x1a   :  { %s527_s11 = smov [#allocation8]  }
  0x1b   :  { %s47_s12 = sshll.u32 %s527_s11, 4  ;;  %s48_s12 = int_to_ptr.vmem [resolvable:$true] %s47_s12 }
  0x1c   :  { %s483_s2 = scalar_lea.vmem %s48_s12, 512  ;;  %p488_p11 = scmp.lt.s32.totalorder %s48_s12, %s48_s12 }
  0x1d   :  { %p484_p10 = scmp.ne.s32.totalorder %s48_s12, %s483_s2  ;;  %p489_p12 = scmp.lt.s32.totalorder %s483_s2, %s483_s2 }
  0x1f   :  { %p490_p13 = por %p489_p12, %p488_p11 }
  0x21   :  { %p491_p0 = pnand %p490_p13, %p484_p10 }
  0x23   :  { %494 = shalt.err (!%p491_p0)
}
  0x24   :  { %53 = dma.hbm_to_vmem [thread:$0]  %s600_s4, 512, %s48_s12, [#allocation7], %s522_s24, %s522_s24, %s523_s25  }
  0x25   :  { %515 = dma.done.wait [#allocation4], 128  }
  0x26   :  { %516 = vsyncadd [#allocation4], 4294967168 }
  0x27   :  { %517 = dma.done.wait [#allocation7], 1024  }
  0x28   :  { %518 = vsyncadd [#allocation7], 4294966272  ;;  %v528_v0 = vmov 0.0   ;;  %vm529_vm0 = vmmov 0   ;;  %vm80_vm1 = vcmask 1043456   ;;  %vm76_vm2 = vcmask 64512  }
  0x29   :  { %391 = vmatprep.subr.bf16.mxu0 %v528_v0  ;;  %397 = vmatprep.subr.bf16.mxu1 %v528_v0  ;;  %v74_v1 = vld [vmem:[#allocation3] sm:$0xf]  ;;  %v75_v2 = vld [vmem:[#allocation3 + $0x4] sm:$0xf]  ;;  %v72_v5 = vld [vmem:[%s597_s1] sm:$0x1] }
  0x2a   :  { %393 = vmatprep.mubr.msk.bf16.mxu0 %vm529_vm0, %v528_v0  ;;  %399 = vmatprep.mubr.msk.bf16.mxu1 %vm529_vm0, %v528_v0  ;;  %v82_v3 = vsel %vm80_vm1, %v74_v1, 0  ;;  %v128_v4 = vsel %vm80_vm1, %v75_v2, 0  ;;  %v73_v6 = vld [vmem:[%s597_s1 + $0x1] sm:$0x1]  ;;  %vm70_vm3 = vcmask 254976   ;;  %v187_v7 = vld [vmem:[#allocation6 + $0x18] sm:$0xff] }
  0x2b   :  { %392 = vmatpush3.bf16.msra.mxu0 %v82_v3  ;;  %398 = vmatpush3.bf16.msra.mxu1 %v128_v4  ;;  %71 = vst.msk [vmem:[#allocation2] sm:$0x3] %vm70_vm3, %v528_v0  ;;  %v186_v8 = vld [vmem:[#allocation6 + $0x10] sm:$0xff]  ;;  %v185_v9 = vld [vmem:[#allocation6 + $0x8] sm:$0xff]  ;;  %v184_v10 = vld [vmem:[#allocation6] sm:$0xff]  ;;  %vm174_vm4 = vcmask 1041409  }
  0x2c   :  { %403 = vmatprep.subr.mxu0 %v528_v0  ;;  %414 = vmatprep.subr.mxu1 %v528_v0  ;;  %v273_v11 = vld [vmem:[#allocation8 + $0x18] sm:$0xff]  ;;  %v272_v12 = vld [vmem:[#allocation8 + $0x10] sm:$0xff]  ;;  %vm195_vm5 = vcmask 261120   ;;  %v271_v26 = vld [vmem:[#allocation8 + $0x8] sm:$0xff]  ;;  %s530_s20 = smov [#allocation9]  }
  0x2d   :  { %v270_v27 = vld [vmem:[#allocation8] sm:$0xff]  ;;  %v373_v28 = vld [vmem:[%s599_s3] ss:$0 sm:$0xff]  ;;  %s361_s21 = sshll.u32 %s530_s20, 4  ;;  %s362_s21 = int_to_ptr.vmem [resolvable:$true] %s361_s21 }
  0x2e   :  { %394 = vmatmul.mubr.msk.bf16.vlgmr.msra.gmra.mxu0 %vm76_vm2, %v72_v5  ;;  %400 = vmatmul.mubr.msk.bf16.vlgmr.msra.gmra.mxu1 %vm76_vm2, %v73_v6  ;;  %v375_v33 = vld [vmem:[%s601_s5] ss:$0 sm:$0xff]  ;;  %s495_s22 = scalar_lea.vmem %s362_s21, 32  ;;  %p500_p2 = scmp.lt.s32.totalorder %s362_s21, %s362_s21 }
  0x2f   :  { %411 = vmatprep.mubr.msk.f32.mxu0 %vm529_vm0, %v528_v0  ;;  %422 = vmatprep.mubr.msk.f32.mxu1 %vm529_vm0, %v528_v0  ;;  %p496_p1 = scmp.ne.s32.totalorder %s362_s21, %s495_s22  ;;  %p501_p3 = scmp.lt.s32.totalorder %s495_s22, %s495_s22 }
  0x30   :  { %404 = vmatpush3.msra.mxu0 %v187_v7  ;;  %415 = vmatpush3.msra.mxu1 %v273_v11 }
  0x31   :  { %405 = vmatprep.subr.mxu0 %v528_v0  ;;  %416 = vmatprep.subr.mxu1 %v528_v0  ;;  %p502_p4 = por %p501_p3, %p500_p2 }
  0x32   :  { %406 = vmatpush3.msra.mxu0 %v186_v8  ;;  %417 = vmatpush3.msra.mxu1 %v272_v12  ;;  %v170_v15 = vld [vmem:[#allocation2] sm:$0x3] }
  0x33   :  { %407 = vmatprep.subr.mxu0 %v528_v0  ;;  %418 = vmatprep.subr.mxu1 %v528_v0  ;;  %p503_p5 = pnand %p502_p4, %p496_p1 }
  0x34   :  { %408 = vmatpush3.msra.mxu0 %v185_v9  ;;  %419 = vmatpush3.msra.mxu1 %v271_v26 }
  0x35   :  { %409 = vmatprep.subr.mxu0 %v528_v0  ;;  %420 = vmatprep.subr.mxu1 %v528_v0 }
  0x36   :  { %410 = vmatpush3.msra.mxu0 %v184_v10  ;;  %421 = vmatpush3.msra.mxu1 %v270_v27 }
  0xee   :  { %v118_v13 = vpop.f32.mrf.mxu0  ;;  %v164_v14 = vpop.f32.mrf.mxu1 }
  0xef   :  { %v173_v16 = vrot.slane %v164_v14, 7 }
  0xf0   :  { %v395_v17 = vpop.f32.mrf.mxu0  ;;  %v401_v18 = vpop.f32.mrf.mxu1 }
  0xf1   :  { %v175_v19 = vsel %vm174_vm4, %v173_v16, %v118_v13 }
  0xf2   :  { %v177_v20 = vadd.f32 %v175_v19, %v170_v15  ;;  %v121_v21 = vpop.f32.mrf.mxu0  ;;  %v167_v22 = vpop.f32.mrf.mxu1 }
  0xf4   :  { %179 = vst.msk [vmem:[#allocation2] sm:$0x3] %vm70_vm3, %v177_v20  ;;  %v396_v23 = vpop.f32.mrf.mxu0  ;;  %v402_v24 = vpop.f32.mrf.mxu1 }
  0xfb   :  { %v183_v25 = vld [vmem:[#allocation2] sm:$0x3] }
  0xfc   :  { %412 = vmatmul.mubr.msk.f32.vlgmr.msra.gmra.mxu0 %vm195_vm5, %v183_v25 }
 0x1bc   :  { %v265_v29 = vpop.f32.mrf.mxu0 }
 0x1bd   :  { %v266_v30 = vadd.f32 %v373_v28, %v265_v29 }
 0x1be   :  { %v413_v31 = vpop.f32.mrf.mxu0 }
 0x1bf   :  { %v269_v32 = vmax.f32 %v266_v30, 0.0 }
 0x1c1   :  { %423 = vmatmul.mubr.msk.f32.vlgmr.msra.gmra.mxu1 %vm195_vm5, %v269_v32 }
 0x281   :  { %v350_v34 = vpop.f32.mrf.mxu1 }
 0x282   :  { %v351_v35 = vadd.f32 %v375_v33, %v350_v34 }
 0x283   :  { %v424_v36 = vpop.f32.mrf.mxu1 }
 0x284   :  { %354 = vst [vmem:[#allocation9] sm:$0x3] %v351_v35 }
 0x285   :  { %506 = shalt.err (!%p503_p5)
}
 0x286   :  { %364 = dma.vmem_to_hbm [thread:$0]  %s362_s21, 32, %s602_s6, [#allocation5]  }
 0x287   :  { %519 = dma.done.wait [#allocation5], 32  }
 0x288   :  { %520 = vsyncadd [#allocation5], 4294967264 }
 0x289   :  { %368 = vsyncpa [#allocation4], 1 }
 0x28a   :  { %369 = vsyncpa [#allocation7], 1 }
 0x28b   :  { %370 = vsyncpa [#allocation5], 1 }

</bundles_post_ra>
